<compile_context>
chip_gen: v6e
topology: v6e:2x2x1
jax: 0.10.0
libtpu: 0.0.40
codegen_flags: <defaults>
</compile_context>

<pallas_src>
import functools

import jax
import jax.numpy as jnp
from jax.experimental import pallas as pl
from jax.experimental.pallas import tpu as pltpu


def _round_up(n: int, m: int) -> int:
    return ((n + m - 1) // m) * m


def _cdiv(a: int, b: int) -> int:
    return -(-a // b)


# ----------------------------- Pallas kernel --------------------------------

def _fused_mlp_kernel(inT_ref, w1T_ref, b1_ref, w2T_ref, b2_ref, oT_ref):
    """Fused per-token MLP, tokens on the lane axis.

    inT_ref : (Din, L)  feature-major [x ; yt ; temb] block (compute dtype)
    w1T_ref : (H, Din)  first-layer weight, transposed
    b1_ref  : (H, 1)    first-layer bias (f32)
    w2T_ref : (Dout, H) second-layer weight, transposed
    b2_ref  : (Dout, 1) second-layer bias (f32)
    oT_ref  : (Dout, L) output block (f32)

    o^T = W2^T @ SiLU(W1^T @ in^T + b1) + b2
    """
    # First Linear on the MXU, f32 accumulation.
    h = jnp.dot(w1T_ref[...], inT_ref[...], preferred_element_type=jnp.float32)
    h = h + b1_ref[...]                                   # (H, 1) bcast over lanes
    # SiLU epilogue in f32 (v5e has no bf16 VPU/EUP); exp lands on the EUP slot.
    h = h * jax.nn.sigmoid(h)
    # Second Linear.
    o = jnp.dot(w2T_ref[...], h.astype(w2T_ref.dtype),
                preferred_element_type=jnp.float32)       # (Dout, L)
    oT_ref[...] = (o + b2_ref[...]).astype(oT_ref.dtype)  # lane-dense store


def fused_mlp_feature_major(inT, w1T, b1c, w2T, b2c, *, lane_tile):
    """inT: (Din, T_pad) compute-dtype slab. Returns o^T (Dout, T_pad) f32."""
    Din, T_pad = inT.shape
    H = w1T.shape[0]
    Dout = w2T.shape[0]
    assert lane_tile % 128 == 0 and T_pad % lane_tile == 0

    # Explicit VMEM budget: 2x double-buffered (input + output) blocks plus the
    # f32 hidden intermediate plus resident weights, with generous headroom.
    # Sized against v7x's 64 MiB physical VMEM (half of v5e/v6e).
    in_item = inT.dtype.itemsize
    blk_in = Din * lane_tile * in_item
    blk_out = Dout * lane_tile * 4
    inter = H * lane_tile * 4
    w_bytes = (H * Din + H + Dout * H + Dout) * 4
    vmem_limit = int(min(max(4 * (2 * (blk_in + blk_out) + inter + 2 * w_bytes),
                             16 * 1024 * 1024),
                         64 * 1024 * 1024))

    grid = (T_pad // lane_tile,)
    return pl.pallas_call(
        _fused_mlp_kernel,
        out_shape=jax.ShapeDtypeStruct((Dout, T_pad), jnp.float32),
        grid_spec=pltpu.PrefetchScalarGridSpec(
            num_scalar_prefetch=0,
            grid=grid,
            in_specs=[
                pl.BlockSpec((Din, lane_tile), lambda i: (0, i)),
                # Grid-invariant (resident) weights / biases: constant index_map,
                # so they are fetched once and reused across all grid steps.
                pl.BlockSpec((H, Din), lambda i: (0, 0)),
                pl.BlockSpec((H, 1), lambda i: (0, 0)),
                pl.BlockSpec((Dout, H), lambda i: (0, 0)),
                pl.BlockSpec((Dout, 1), lambda i: (0, 0)),
            ],
            out_specs=pl.BlockSpec((Dout, lane_tile), lambda i: (0, i)),
        ),
        compiler_params=pltpu.CompilerParams(
            dimension_semantics=("parallel",),
            vmem_limit_bytes=vmem_limit),
    )(inT, w1T, b1c, w2T, b2c)


# --------------------------- DiffusionModel glue -----------------------------

def sinusoidal_time_embedding(t, dim):
    """t: (B,) int -> (B, dim) float32 sinusoidal embedding (dim must be even)."""
    half = dim // 2
    freqs = jnp.exp(-jnp.log(10000.0) * jnp.arange(half, dtype=jnp.float32) / half)
    args = t.astype(jnp.float32)[:, None] * freqs[None, :]
    return jnp.concatenate([jnp.sin(args), jnp.cos(args)], axis=-1)


def _choose_lane_tile(num_tokens: int, max_lane_tile: int):
    """Pick a 128-multiple lane tile, keeping >= 2 grid steps when possible
    (v7x has 2 TensorCores sharing the parallel grid axis) and bounding the
    padding of the flattened token axis."""
    t128 = _round_up(max(num_tokens, 1), 128)
    n_tiles = _cdiv(t128, max_lane_tile)
    if n_tiles < 2 and t128 >= 256:
        n_tiles = 2
    lane_tile = _round_up(_cdiv(t128, n_tiles), 128)
    t_pad = _round_up(t128, lane_tile)
    return lane_tile, t_pad


class DiffusionModelPallas:
    """JAX/Pallas port of DiffusionModel.forward.

    forward(x, yt, t) = model(input_constructor(x, yt, t))
      x : (B, S, Fx) conditioning
      yt: (B, S, Fy) noisy target (Fy == output_shape[1])
      t : (B,) int diffusion step
    Returns (B, *output_shape) = (B, S, Fy), float32.
    """

    def __init__(self, key, feat_x, feat_y, t_emb_dim, hidden, output_shape,
                 compute_dtype=jnp.bfloat16, max_lane_tile=8192):
        assert t_emb_dim % 2 == 0, "sinusoidal embedding needs an even dim"
        assert max_lane_tile % 128 == 0 and max_lane_tile >= 128
        self.name = "diffusion_mlp_pallas"
        self.data_pred = True
        self.output_shape = output_shape          # (S, Fy)
        self.t_emb_dim = t_emb_dim
        self.feat_x = feat_x
        self.feat_y = feat_y
        # bf16 MXU inputs by default on every generation (v5e MXU takes bf16;
        # accumulation and the SiLU/bias epilogue stay f32).
        self.compute_dtype = compute_dtype
        self.max_lane_tile = max_lane_tile
        din = feat_x + feat_y + t_emb_dim
        dout = output_shape[1]
        k1, k2, k3, k4 = jax.random.split(key, 4)
        # Deterministic synthetic parameters (not a checkpoint load).
        self.w1 = jax.random.normal(k1, (din, hidden), jnp.float32) * 0.1
        self.b1 = jax.random.normal(k2, (1, hidden), jnp.float32) * 0.01
        self.w2 = jax.random.normal(k3, (hidden, dout), jnp.float32) * 0.1
        self.b2 = jax.random.normal(k4, (1, dout), jnp.float32) * 0.01
        # Kernel-layout copies: feature-major (transposed); MXU inputs in
        # compute_dtype, biases stay f32 (f32 accumulation + f32 epilogue).
        self.w1_T = self.w1.T.astype(compute_dtype)    # (H, Din)
        self.b1_c = self.b1.T                          # (H, 1)   f32
        self.w2_T = self.w2.T.astype(compute_dtype)    # (Dout, H)
        self.b2_c = self.b2.T                          # (Dout, 1) f32

    def input_constructor(self, x, yt, t):
        """Reference (module-faithful) input construction: concat in HBM."""
        B, S, _ = x.shape
        temb = sinusoidal_time_embedding(t, self.t_emb_dim)          # (B, E)
        temb = jnp.broadcast_to(temb[:, None, :], (B, S, self.t_emb_dim))
        return jnp.concatenate([x, yt, temb], axis=-1)               # (B, S, Din)

    @functools.partial(jax.jit, static_argnums=0)
    def forward(self, x, yt, t):
        B, S, Fx = x.shape
        Fy, E = self.feat_y, self.t_emb_dim
        T = B * S                                       # flattened token axis
        lane_tile, T_pad = _choose_lane_tile(T, self.max_lane_tile)

        # Per-token time embedding (tiles may span batch boundaries, so the
        # time term rides in the fused input slab rather than as a per-batch
        # bias).
        temb = sinusoidal_time_embedding(t, self.t_emb_dim)          # (B, E)
        temb_tok = jnp.broadcast_to(temb[:, None, :], (B, S, E)).reshape(T, E)

        # One fused feature-major input slab [x ; yt ; temb] -> (Din, T_pad).
        # XLA fuses the reshape/concat/transpose/pad/cast into a single pass.
        inp = jnp.concatenate(
            [x.reshape(T, Fx), yt.reshape(T, Fy), temb_tok], axis=-1)  # (T, Din)
        inT = jnp.pad(inp.T, ((0, 0), (0, T_pad - T))).astype(self.compute_dtype)

        outT = fused_mlp_feature_major(inT, self.w1_T, self.b1_c,
                                       self.w2_T, self.b2_c,
                                       lane_tile=lane_tile)          # (Dout, T_pad)
        # Padded lanes (>= T) carry SiLU(b1)-derived garbage; slice them off
        # before handing back the module-contract layout.
        out = jnp.transpose(outT[:, :T]).reshape(B, *self.output_shape)
        return out

    def predict(self, x, yt, t):
        return self.forward(x, yt, t)


# ---------------------------------- main -------------------------------------

if __name__ == "__main__":
    key = jax.random.PRNGKey(0)
    kx, ky, kp = jax.random.split(key, 3)

    B, S = 2, 8          # batch, sequence length
    Fx, Fy = 4, 4        # conditioning / target feature dims
    T_EMB, HID = 8, 32   # time-embedding dim, MLP hidden dim

    x = jax.random.normal(kx, (B, S, Fx), jnp.float32)
    yt = jax.random.normal(ky, (B, S, Fy), jnp.float32)
    t = jnp.full((B,), 5, dtype=jnp.int32)

    def gold(dm, x_, yt_, t_):
        """High-precision reference of the original forward (concat -> MLP)."""
        B_, S_, _ = x_.shape
        inp = dm.input_constructor(x_, yt_, t_).reshape(B_ * S_, -1)
        h = jnp.dot(inp, dm.w1, precision="highest") + dm.b1
        h = h * jax.nn.sigmoid(h)
        o = jnp.dot(h, dm.w2, precision="highest") + dm.b2
        return o.reshape(B_, S_, dm.output_shape[1])

    # Default path: bf16 MXU inputs (all generations), f32 accumulation +
    # f32 SiLU/bias epilogue.
    dm = DiffusionModelPallas(kp, Fx, Fy, T_EMB, HID, output_shape=(S, Fy))
    out = jax.block_until_ready(dm.forward(x, yt, t))
    assert out.shape == (B, S, Fy)
    assert jnp.allclose(out, gold(dm, x, yt, t), atol=3e-2, rtol=3e-2)

    # f32 MXU path, tight tolerance (layout / fusion bug detector).
    dm32 = DiffusionModelPallas(kp, Fx, Fy, T_EMB, HID, output_shape=(S, Fy),
                                compute_dtype=jnp.float32)
    out32 = jax.block_until_ready(dm32.forward(x, yt, t))
    assert out32.shape == (B, S, Fy)
    assert jnp.allclose(out32, gold(dm32, x, yt, t), atol=5e-3, rtol=5e-3)

    # Multi-tile grid check: flattened token axis spans 2 lane tiles, with a
    # batch's tokens split across a tile boundary and per-batch time steps.
    B2, S2 = 3, 100
    x2 = jax.random.normal(kx, (B2, S2, Fx), jnp.float32)
    yt2 = jax.random.normal(ky, (B2, S2, Fy), jnp.float32)
    t2 = jnp.arange(B2, dtype=jnp.int32) + 3
    dm2 = DiffusionModelPallas(kp, Fx, Fy, T_EMB, HID, output_shape=(S2, Fy),
                               compute_dtype=jnp.float32)
    out2 = jax.block_until_ready(dm2.forward(x2, yt2, t2))
    assert out2.shape == (B2, S2, Fy)
    assert jnp.allclose(out2, gold(dm2, x2, yt2, t2), atol=5e-3, rtol=5e-3)

    print("KERNEL_OK")
</pallas_src>

<mosaic_0001>
module attributes {stable_mosaic.version = 11 : i64} {
  func.func @_fused_mlp_kernel(%arg0: i32, %arg1: memref<16x128xbf16, #tpu.memory_space<vmem>>, %arg2: memref<32x16xbf16, #tpu.memory_space<vmem>>, %arg3: memref<32x1xf32, #tpu.memory_space<vmem>>, %arg4: memref<4x32xbf16, #tpu.memory_space<vmem>>, %arg5: memref<4x1xf32, #tpu.memory_space<vmem>>, %arg6: memref<4x128xf32, #tpu.memory_space<vmem>>) attributes {dimension_semantics = [#tpu.dimension_semantics<parallel>], iteration_bounds = array<i64: 1>, scalar_prefetch = 0 : i64, scratch_operands = 0 : i64, tpu.core_type = #tpu.core_type<tc>, window_params = [{transform_indices = @transform_0, window_bounds = array<i64: 16, 128>}, {pipeline_mode = #tpu.pipeline_mode<synchronous>, transform_indices = @transform_1, window_bounds = array<i64: 32, 16>}, {pipeline_mode = #tpu.pipeline_mode<synchronous>, transform_indices = @transform_2, window_bounds = array<i64: 32, 1>}, {pipeline_mode = #tpu.pipeline_mode<synchronous>, transform_indices = @transform_3, window_bounds = array<i64: 4, 32>}, {pipeline_mode = #tpu.pipeline_mode<synchronous>, transform_indices = @transform_4, window_bounds = array<i64: 4, 1>}, {transform_indices = @transform_5, window_bounds = array<i64: 4, 128>}]} {
    %c0 = arith.constant 0 : index
    %c0_0 = arith.constant 0 : index
    %0 = vector.load %arg2[%c0, %c0_0] : memref<32x16xbf16, #tpu.memory_space<vmem>>, vector<32x16xbf16>
    %c0_1 = arith.constant 0 : index
    %c0_2 = arith.constant 0 : index
    %1 = vector.load %arg1[%c0_1, %c0_2] : memref<16x128xbf16, #tpu.memory_space<vmem>>, vector<16x128xbf16>
    %cst = arith.constant dense<0.000000e+00> : vector<32x128xf32>
    %2 = tpu.matmul %0, %1, %cst {dimension_numbers = #tpu.dot_dimension_numbers<[1], [0], [0], [1], [0, 0, 1, 1], [], []>} : vector<32x16xbf16>, vector<16x128xbf16>, vector<32x128xf32> -> vector<32x128xf32>
    %c0_3 = arith.constant 0 : index
    %c0_4 = arith.constant 0 : index
    %3 = vector.load %arg3[%c0_3, %c0_4] : memref<32x1xf32, #tpu.memory_space<vmem>>, vector<32x1xf32>
    %4 = vector.broadcast %3 : vector<32x1xf32> to vector<32x128xf32>
    %5 = arith.addf %2, %4 : vector<32x128xf32>
    %6 = arith.negf %5 : vector<32x128xf32>
    %7 = math.exp %6 : vector<32x128xf32>
    %cst_5 = arith.constant 1.000000e+00 : f32
    %8 = vector.broadcast %cst_5 : f32 to vector<32x128xf32>
    %9 = arith.addf %8, %7 : vector<32x128xf32>
    %10 = arith.divf %8, %9 : vector<32x128xf32>
    %11 = arith.mulf %5, %10 : vector<32x128xf32>
    %c0_6 = arith.constant 0 : index
    %c0_7 = arith.constant 0 : index
    %12 = vector.load %arg4[%c0_6, %c0_7] : memref<4x32xbf16, #tpu.memory_space<vmem>>, vector<4x32xbf16>
    %13 = arith.truncf %11 : vector<32x128xf32> to vector<32x128xbf16>
    %cst_8 = arith.constant dense<0.000000e+00> : vector<4x128xf32>
    %14 = tpu.matmul %12, %13, %cst_8 {dimension_numbers = #tpu.dot_dimension_numbers<[1], [0], [0], [1], [0, 0, 1, 1], [], []>} : vector<4x32xbf16>, vector<32x128xbf16>, vector<4x128xf32> -> vector<4x128xf32>
    %c0_9 = arith.constant 0 : index
    %c0_10 = arith.constant 0 : index
    %15 = vector.load %arg5[%c0_9, %c0_10] : memref<4x1xf32, #tpu.memory_space<vmem>>, vector<4x1xf32>
    %16 = vector.broadcast %15 : vector<4x1xf32> to vector<4x128xf32>
    %17 = arith.addf %14, %16 : vector<4x128xf32>
    %c0_11 = arith.constant 0 : index
    %c0_12 = arith.constant 0 : index
    %18 = vector.load %arg6[%c0_11, %c0_12] : memref<4x128xf32, #tpu.memory_space<vmem>>, vector<4x128xf32>
    tpu.vector_store %arg6[%c0_11, %c0_12], %17 {strides = array<i32>} : memref<4x128xf32, #tpu.memory_space<vmem>>, vector<4x128xf32>,
    return
  }
  func.func @transform_0(%arg0: i32) -> (i32, i32) {
    %c0_i32 = arith.constant 0 : i32
    %c0_i32_0 = arith.constant 0 : i32
    return %c0_i32, %arg0 : i32, i32
  }
  func.func @transform_1(%arg0: i32) -> (i32, i32) {
    %c0_i32 = arith.constant 0 : i32
    %c0_i32_0 = arith.constant 0 : i32
    %c0_i32_1 = arith.constant 0 : i32
    return %c0_i32, %c0_i32_0 : i32, i32
  }
  func.func @transform_2(%arg0: i32) -> (i32, i32) {
    %c0_i32 = arith.constant 0 : i32
    %c0_i32_0 = arith.constant 0 : i32
    %c0_i32_1 = arith.constant 0 : i32
    return %c0_i32, %c0_i32_0 : i32, i32
  }
  func.func @transform_3(%arg0: i32) -> (i32, i32) {
    %c0_i32 = arith.constant 0 : i32
    %c0_i32_0 = arith.constant 0 : i32
    %c0_i32_1 = arith.constant 0 : i32
    return %c0_i32, %c0_i32_0 : i32, i32
  }
  func.func @transform_4(%arg0: i32) -> (i32, i32) {
    %c0_i32 = arith.constant 0 : i32
    %c0_i32_0 = arith.constant 0 : i32
    %c0_i32_1 = arith.constant 0 : i32
    return %c0_i32, %c0_i32_0 : i32, i32
  }
  func.func @transform_5(%arg0: i32) -> (i32, i32) {
    %c0_i32 = arith.constant 0 : i32
    %c0_i32_0 = arith.constant 0 : i32
    return %c0_i32, %arg0 : i32, i32
  }
}

</mosaic_0001>

<bundles_post_ra>
// kernel: forward.1
= control target key start
LH: loop header
LB: loop body
LE: loop exit
PB: predicated region body
PF: predicated region fallthrough
CT: control target
= control target key end

     0   :  { %vm67_vm0 = vcmask 130048   ;;  %v263_v1 = vmov 0   ;;  %v264_v9 = vmov 0.0   ;;  %vm265_vm1 = vmmov 0   ;;  %s326_s0 = inlined_call_operand.vmem [shape: bf16[16,128], index: 0, kind: input, shape index: {}]   ;;  %s327_s1 = inlined_call_operand.vmem [shape: bf16[32,16], index: 1, kind: input, shape index: {}]   ;;  %s328_s2 = inlined_call_operand.vmem [shape: f32[32,1], index: 2, kind: input, shape index: {}]   ;;  %s329_s4 = inlined_call_operand.vmem [shape: f32[4,1], index: 4, kind: input, shape index: {}]   ;;  %s330_s3 = inlined_call_operand.vmem [shape: bf16[4,32], index: 3, kind: input, shape index: {}]   ;;  %s331_s5 = inlined_call_operand.vmem [shape: f32[4,128], index: 5, kind: output, shape index: {}]  }
   0x1   :  { %v244_v0 = vld [vmem:[%s326_s0] sm:$0xff]   ;;  %242 = vset.pattern.permute.xlu0 %v263_v1  ;;  %243 = vset.pattern.permute.xlu1 %v263_v1  ;;  %v246_v3 = vld [vmem:[%s327_s1 + $0x8] sm:$0xff]   ;;  %v29_v4 = vld [vmem:[%s328_s2 + $0x10] sm:$0xff]  ;;  %vm160_vm2 = vcmask 261120  }
   0x2   :  { %v245_v2 = vld [vmem:[%s327_s1] sm:$0xff]   ;;  %225 = vmatprep.subr.bf16.mxu0 %v244_v0  ;;  %43 = vperm.xlu0 %242, %v29_v4   ;;  %v30_v6 = vld [vmem:[%s328_s2 + $0x18] sm:$0xff]  ;;  %v28_v7 = vld [vmem:[%s328_s2 + $0x8] sm:$0xff] }
   0x3   :  { %226 = vmatpush3.bf16.msra.mxu0 %v244_v0  ;;  %227 = vmatprep.mubr.msk.bf16.mxu0 %vm67_vm0, %v245_v2  ;;  %v27_v5 = vld [vmem:[%s328_s2] sm:$0xff] }
   0x4   :  { %33 = vperm.xlu1 %243, %v27_v5   ;;  %v154_v8 = vld [vmem:[%s329_s4] sm:$0xf]  ;;  %231 = vmatprep.subr.bf16.mxu1 %v264_v9 }
   0x5   :  { %235 = vmatprep.mubr.msk.bf16.mxu1 %vm265_vm1, %v264_v9  ;;  %v151_v44 = vld [vmem:[%s330_s3] sm:$0x3] }
   0x6   :  { %228 = vmatmul.mubr.msk.bf16.vlgmr.msra.gmra.mxu0 %vm67_vm0, %v246_v3  ;;  %48 = vperm.xlu0 %242, %v30_v6  }
   0x8   :  { %38 = vperm.xlu1 %243, %v28_v7  }
   0xa   :  { %157 = vperm.xlu0 %242, %v154_v8  }
  0x7d   :  { %v44_v10 = vpop.permute.xlu0 %43 }
  0x7f   :  { %v34_v11 = vpop.permute.xlu1 %33 }
  0x81   :  { %v49_v17 = vpop.permute.xlu0 %48 }
  0x83   :  { %v39_v21 = vpop.permute.xlu1 %38 }
  0x85   :  { %v158_v45 = vpop.permute.xlu0 %157 }
  0xc6   :  { %v229_v12 = vpop.f32.mrf.mxu0 }
  0xc7   :  { %v117_v13 = vadd.f32 %v229_v12, %v44_v10 }
  0xc8   :  { %v108_v14 = vpop.f32.mrf.mxu0 }
  0xc9   :  { %v216_v15 = vmul.f32 -1.442695, %v117_v13  ;;  %v109_v16 = vadd.f32 %v108_v14, %v34_v11 }
  0xca   :  { %v230_v18 = vpop.f32.mrf.mxu0 }
  0xcb   :  { %247 = vpow2.f32 %v216_v15  ;;  %v214_v19 = vmul.f32 -1.442695, %v109_v16  ;;  %v120_v20 = vadd.f32 %v230_v18, %v49_v17 }
  0xcc   :  { %v111_v22 = vpop.f32.mrf.mxu0 }
  0xcd   :  { %249 = vpow2.f32 %v214_v19  ;;  %v217_v23 = vmul.f32 -1.442695, %v120_v20  ;;  %v112_v24 = vadd.f32 %v111_v22, %v39_v21 }
  0xcf   :  { %251 = vpow2.f32 %v217_v23  ;;  %v215_v25 = vmul.f32 -1.442695, %v112_v24 }
  0xd1   :  { %253 = vpow2.f32 %v215_v25 }
  0xd8   :  { %v248_v26 = vpop.eup %247 }
  0xd9   :  { %v137_v27 = vadd.f32 1.0, %v248_v26 }
  0xda   :  { %v250_v28 = vpop.eup %249 }
  0xdb   :  { %v135_v30 = vadd.f32 1.0, %v250_v28  ;;  %255 = vrcp.f32 %v137_v27 }
  0xdc   :  { %v252_v29 = vpop.eup %251 }
  0xdd   :  { %v138_v31 = vadd.f32 1.0, %v252_v29 }
  0xde   :  { %v254_v32 = vpop.eup %253 }
  0xdf   :  { %257 = vrcp.f32 %v138_v31  ;;  %v136_v33 = vadd.f32 1.0, %v254_v32 }
  0xe0   :  { %259 = vrcp.f32 %v135_v30 }
  0xe1   :  { %261 = vrcp.f32 %v136_v33 }
  0xe8   :  { %v256_v34 = vpop.eup %255 }
  0xe9   :  { %v149_v37 = vmul.f32 %v256_v34, %v117_v13 }
  0xec   :  { %v258_v35 = vpop.eup %257 }
  0xed   :  { %v260_v36 = vpop.eup %259  ;;  %v150_v38 = vmul.f32 %v258_v35, %v120_v20 }
  0xee   :  { %v262_v39 = vpop.eup %261  ;;  %v147_v42 = vmul.f32 %v260_v36, %v109_v16 }
  0xef   :  { %v148_v40 = vmul.f32 %v262_v39, %v112_v24  ;;  %v153_v41 = vpack.c.bf16 %v150_v38, %v149_v37 }
  0xf1   :  { %232 = vmatpush3.bf16.msra.mxu1 %v153_v41  ;;  %v152_v43 = vpack.c.bf16 %v148_v40, %v147_v42 }
  0xf2   :  { %233 = vmatprep.subr.bf16.mxu1 %v264_v9 }
  0xf5   :  { %234 = vmatpush3.bf16.msra.mxu1 %v152_v43 }
  0xf8   :  { %236 = vmatmul.mubr.msk.bf16.vlgmr.msra.gmra.mxu1 %vm160_vm2, %v151_v44 }
 0x1b8   :  { %v198_v46 = vpop.f32.mrf.mxu1 }
 0x1b9   :  { %v199_v47 = vadd.f32 %v198_v46, %v158_v45 }
 0x1ba   :  { %v237_v48 = vpop.f32.mrf.mxu1 }
 0x1bb   :  { %204 = vst [vmem:[%s331_s5] sm:$0xf] %v199_v47 }
 0x1bc   :  { %v201_v49 = vpop.f32.mrf.mxu1 }
 0x1be   :  { %v238_v50 = vpop.f32.mrf.mxu1 }

</bundles_post_ra>
